<compile_context>
chip_gen: v6e
topology: v6e:2x2x1
jax: 0.10.0
libtpu: 0.0.40
codegen_flags: <defaults>
</compile_context>

<pallas_src>
import math

import jax
import jax.numpy as jnp
from jax import lax
from jax.experimental import pallas as pl
from jax.experimental.pallas import tpu as pltpu

INV_SQRT2 = 1.0 / math.sqrt(2.0)   # multiply, never divide, by sqrt(2)
GN_EPS = 1e-5                      # nn.GroupNorm default eps
NEG_SLOPE = 0.2                    # LeakyReLU(0.2)

# Cap on samples per block: bounds the statically-unrolled per-sample matmul
# count (and compile time).  64 samples already puts small-C*L cases at >=1 MiB
# blocks, which is on the ~85% HBM-roofline plateau for this mem-bound kernel.
_MAX_NB = 64


def _cdiv(a, b):
    return (a + b - 1) // b


def _chip_defaults():
    """Generation-gated sizing.

    v7x has 64 MiB VMEM per TensorCore and 2 TCs/chip (needs even grid parity
    and a tighter VMEM budget); v5e/v6e have 128 MiB and a single TC (maximize
    block size, never shrink blocks for parallelism).  Keyed off VMEM capacity
    so the heuristic degrades gracefully if the query is unavailable.
    """
    try:
        info = pltpu.get_tpu_info()
        vmem_cap = int(getattr(info, "vmem_capacity_bytes", 0) or 0)
    except Exception:  # query unavailable (e.g. interpret mode)
        vmem_cap = 0
    if vmem_cap >= 100 * 1024 * 1024:        # v5e / v6e: 128 MiB VMEM, 1 TC
        return {"target_block_bytes": 4 << 20, "vmem_limit": 64 << 20,
                "two_cores": False}
    if vmem_cap > 0:                          # v7x: 64 MiB VMEM, 2 TCs
        return {"target_block_bytes": 2 << 20, "vmem_limit": 32 << 20,
                "two_cores": True}
    # Unknown chip: conservative budgets that fit every generation.
    return {"target_block_bytes": 2 << 20, "vmem_limit": 32 << 20,
            "two_cores": False}


def residual_block_kernel(x_ref, w_ref, b_ref, gamma_ref, beta_ref, o_ref):
    # x_ref/o_ref: (nb, C, L); w: (C, C); b/gamma/beta: (C, 1).
    nb, c, l = x_ref.shape

    # Upcast once; all arithmetic (matmul accumulation, GN stats) stays f32 so
    # bf16 I/O only changes HBM bytes, not the math (and keeps v5e, which has
    # no bf16 VPU/EUP, on its native f32 path).
    xf = x_ref[...].astype(jnp.float32)                   # (nb, C, L)
    w = w_ref[...].astype(jnp.float32)                    # (C, C)
    b = b_ref[...].astype(jnp.float32)[None]              # (1, C, 1)
    gamma = gamma_ref[...].astype(jnp.float32)[None]      # (1, C, 1)
    beta = beta_ref[...].astype(jnp.float32)[None]        # (1, C, 1)

    # Conv1d(kernel_size=1) == per-sample channel-mixing matmul.  Statically
    # unrolled 2-D dots keep W un-broadcast (no (nb, C, C) replica written to
    # VMEM) and the channel axis on sublanes / L on lanes.
    # TODO(synk): a weight-stationary MXU formulation (pltpu.matmul_push_rhs
    # once + matmul_acc_lhs per sample slice) would also avoid re-pushing W per
    # sample; unnecessary while the kernel is HBM-bandwidth bound.
    y = jnp.stack(
        [jnp.dot(w, xf[i], preferred_element_type=jnp.float32)
         for i in range(nb)],
        axis=0,
    ) + b                                                 # (nb, C, L)

    # GroupNorm(num_groups=1): per-sample stats over (C, L) in a single pass.
    # Reduce the lane axis first, finish on the small (nb, C, 1) partials.
    # One-pass E[y^2]-E[y]^2 is clamped at 0; fine at these magnitudes (switch
    # to a two-pass / shifted form if tolerances tighten or activations grow).
    inv_cl = 1.0 / float(c * l)
    ps = jnp.sum(y, axis=2, keepdims=True)                # (nb, C, 1)
    pss = jnp.sum(y * y, axis=2, keepdims=True)           # (nb, C, 1)
    mean = jnp.sum(ps, axis=1, keepdims=True) * inv_cl    # (nb, 1, 1)
    msq = jnp.sum(pss, axis=1, keepdims=True) * inv_cl    # (nb, 1, 1)
    var = jnp.maximum(msq - mean * mean, 0.0)

    # Fold normalize + affine into one scale/shift per (sample, channel).
    # Padded samples give var=0 -> rsqrt(eps) (large but finite); the wrapper
    # slices them off, and per-sample stats keep real samples uncontaminated.
    scale = gamma * lax.rsqrt(var + GN_EPS)               # (nb, C, 1)
    shift = beta - mean * scale                           # (nb, C, 1)
    y = y * scale + shift

    # LeakyReLU(0.2): one mul + one max per element (no compare/select).
    y = jnp.maximum(y, NEG_SLOPE * y)

    # ResidualBlock.forward: (fn(x) + x) / sqrt(2).
    o_ref[...] = ((y + xf) * INV_SQRT2).astype(o_ref.dtype)


def residual_block(x, w, b, gamma, beta):
    """x: (N, C, L); w: (C, C); b, gamma, beta: (C, 1).

    Works for float32 or bfloat16 `x` (output matches x.dtype); GroupNorm
    statistics and matmul accumulation stay float32 inside the kernel.
    """
    N, C, L = x.shape
    cfg = _chip_defaults()

    # Block sizing: f32 intermediates dominate VMEM regardless of I/O dtype.
    per_sample_f32 = C * L * 4
    nb = max(1, min(N, _MAX_NB,
                    cfg["target_block_bytes"] // max(per_sample_f32, 1)))
    # TODO(synk): if a single sample (C*L*4) exceeds the block budget, an
    # L-split two-phase-stats pass would be needed to bound VMEM on v7x (and to
    # occupy both its cores when N == 1); not required at these shapes.

    n_blocks = _cdiv(N, nb)
    if cfg["two_cores"] and N >= 2 and n_blocks % 2 == 1:
        # v7x shards the "parallel" grid axis across its 2 TensorCores: an odd
        # grid leaves one core idle up to ~33%, so round the block count to
        # even (never applied on single-TC v5e/v6e, where it would only shrink
        # blocks for zero parallelism benefit).
        n_blocks += 1
        nb = max(1, _cdiv(N, n_blocks))

    n_pad = nb * n_blocks
    if n_pad != N:
        # Padded rows yield benign finite values (see var=0 note in kernel)
        # and are sliced off below.
        x_in = jnp.pad(x, ((0, n_pad - N), (0, 0), (0, 0)))
    else:
        x_in = x

    out = pl.pallas_call(
        residual_block_kernel,
        out_shape=jax.ShapeDtypeStruct((n_pad, C, L), x.dtype),
        grid_spec=pltpu.PrefetchScalarGridSpec(
            num_scalar_prefetch=0,
            grid=(n_blocks,),
            in_specs=[
                pl.BlockSpec((nb, C, L), lambda n: (n, 0, 0)),
                pl.BlockSpec((C, C), lambda n: (0, 0)),
                pl.BlockSpec((C, 1), lambda n: (0, 0)),
                pl.BlockSpec((C, 1), lambda n: (0, 0)),
                pl.BlockSpec((C, 1), lambda n: (0, 0)),
            ],
            out_specs=pl.BlockSpec((nb, C, L), lambda n: (n, 0, 0)),
        ),
        compiler_params=pltpu.CompilerParams(
            dimension_semantics=("parallel",),
            vmem_limit_bytes=cfg["vmem_limit"],
        ),
    )(x_in, w, b, gamma, beta)

    return out[:N] if n_pad != N else out


def residual_block_reference(x, w, b, gamma, beta):
    """Pure-JAX reference mirroring the PyTorch module (two-pass stats)."""
    y = jnp.einsum("ck,nkl->ncl", w, x) + b[None]            # Conv1d(k=1)
    mean = y.mean(axis=(1, 2), keepdims=True)                # GroupNorm(groups=1)
    var = ((y - mean) ** 2).mean(axis=(1, 2), keepdims=True)
    y = (y - mean) / jnp.sqrt(var + GN_EPS)
    y = y * gamma[None] + beta[None]
    y = jnp.where(y >= 0, y, NEG_SLOPE * y)                  # LeakyReLU(0.2)
    return (y + x) / math.sqrt(2.0)                          # residual + /sqrt(2)


if __name__ == "__main__":
    # N=5 exercises sample batching and (on v7x) the even-grid padding path.
    N, C, L = 5, 32, 128

    key = jax.random.PRNGKey(0)
    kx, kw, kb = jax.random.split(key, 3)

    x = jax.random.normal(kx, (N, C, L), dtype=jnp.float32)

    # Deterministic PyTorch-like uniform init for Conv1d(k=1).
    bound = 1.0 / math.sqrt(C)
    w = jax.random.uniform(kw, (C, C), jnp.float32, -bound, bound)
    b = jax.random.uniform(kb, (C, 1), jnp.float32, -bound, bound)
    gamma = jnp.ones((C, 1), jnp.float32)   # GroupNorm default init
    beta = jnp.zeros((C, 1), jnp.float32)

    # f32 path: matches the PyTorch module's default precision.
    out = jax.block_until_ready(residual_block(x, w, b, gamma, beta))
    ref = residual_block_reference(x, w, b, gamma, beta)
    assert out.shape == (N, C, L)
    assert jnp.allclose(out, ref, atol=2e-4, rtol=2e-4)

    # bf16 I/O path: halves HBM bytes (the dominant cost); compute stays f32.
    x_bf = x.astype(jnp.bfloat16)
    out_bf = jax.block_until_ready(residual_block(x_bf, w, b, gamma, beta))
    ref_bf = residual_block_reference(x_bf.astype(jnp.float32), w, b, gamma, beta)
    assert out_bf.dtype == jnp.bfloat16
    assert jnp.allclose(out_bf.astype(jnp.float32), ref_bf, atol=5e-2, rtol=2e-2)

    print("KERNEL_OK")
</pallas_src>

<mosaic_0001>
module attributes {stable_mosaic.version = 11 : i64} {
  func.func @residual_block_kernel(%arg0: i32, %arg1: memref<5x32x128xf32, #tpu.memory_space<vmem>>, %arg2: memref<32x32xf32, #tpu.memory_space<vmem>>, %arg3: memref<32x1xf32, #tpu.memory_space<vmem>>, %arg4: memref<32x1xf32, #tpu.memory_space<vmem>>, %arg5: memref<32x1xf32, #tpu.memory_space<vmem>>, %arg6: memref<5x32x128xf32, #tpu.memory_space<vmem>>) attributes {dimension_semantics = [#tpu.dimension_semantics<parallel>], iteration_bounds = array<i64: 1>, scalar_prefetch = 0 : i64, scratch_operands = 0 : i64, tpu.core_type = #tpu.core_type<tc>, window_params = [{transform_indices = @transform_0, window_bounds = array<i64: 5, 32, 128>}, {pipeline_mode = #tpu.pipeline_mode<synchronous>, transform_indices = @transform_1, window_bounds = array<i64: 32, 32>}, {pipeline_mode = #tpu.pipeline_mode<synchronous>, transform_indices = @transform_2, window_bounds = array<i64: 32, 1>}, {pipeline_mode = #tpu.pipeline_mode<synchronous>, transform_indices = @transform_3, window_bounds = array<i64: 32, 1>}, {pipeline_mode = #tpu.pipeline_mode<synchronous>, transform_indices = @transform_4, window_bounds = array<i64: 32, 1>}, {transform_indices = @transform_5, window_bounds = array<i64: 5, 32, 128>}]} {
    %c0 = arith.constant 0 : index
    %c0_0 = arith.constant 0 : index
    %c0_1 = arith.constant 0 : index
    %0 = vector.load %arg1[%c0, %c0_0, %c0_1] : memref<5x32x128xf32, #tpu.memory_space<vmem>>, vector<5x32x128xf32>
    %c0_2 = arith.constant 0 : index
    %c0_3 = arith.constant 0 : index
    %1 = vector.load %arg2[%c0_2, %c0_3] : memref<32x32xf32, #tpu.memory_space<vmem>>, vector<32x32xf32>
    %c0_4 = arith.constant 0 : index
    %c0_5 = arith.constant 0 : index
    %2 = vector.load %arg3[%c0_4, %c0_5] : memref<32x1xf32, #tpu.memory_space<vmem>>, vector<32x1xf32>
    %3 = vector.shape_cast %2 : vector<32x1xf32> to vector<1x32x1xf32>
    %c0_6 = arith.constant 0 : index
    %c0_7 = arith.constant 0 : index
    %4 = vector.load %arg4[%c0_6, %c0_7] : memref<32x1xf32, #tpu.memory_space<vmem>>, vector<32x1xf32>
    %5 = vector.shape_cast %4 : vector<32x1xf32> to vector<1x32x1xf32>
    %c0_8 = arith.constant 0 : index
    %c0_9 = arith.constant 0 : index
    %6 = vector.load %arg5[%c0_8, %c0_9] : memref<32x1xf32, #tpu.memory_space<vmem>>, vector<32x1xf32>
    %7 = vector.shape_cast %6 : vector<32x1xf32> to vector<1x32x1xf32>
    %8 = vector.extract_strided_slice %0 {offsets = [0, 0, 0], sizes = [1, 32, 128], strides = [1, 1, 1]} : vector<5x32x128xf32> to vector<1x32x128xf32>
    %9 = vector.shape_cast %8 : vector<1x32x128xf32> to vector<32x128xf32>
    %cst = arith.constant dense<0.000000e+00> : vector<32x128xf32>
    %10 = tpu.matmul %1, %9, %cst {dimension_numbers = #tpu.dot_dimension_numbers<[1], [0], [0], [1], [0, 0, 1, 1], [], []>} : vector<32x32xf32>, vector<32x128xf32>, vector<32x128xf32> -> vector<32x128xf32>
    %11 = vector.extract_strided_slice %0 {offsets = [1, 0, 0], sizes = [1, 32, 128], strides = [1, 1, 1]} : vector<5x32x128xf32> to vector<1x32x128xf32>
    %12 = vector.shape_cast %11 : vector<1x32x128xf32> to vector<32x128xf32>
    %cst_10 = arith.constant dense<0.000000e+00> : vector<32x128xf32>
    %13 = tpu.matmul %1, %12, %cst_10 {dimension_numbers = #tpu.dot_dimension_numbers<[1], [0], [0], [1], [0, 0, 1, 1], [], []>} : vector<32x32xf32>, vector<32x128xf32>, vector<32x128xf32> -> vector<32x128xf32>
    %14 = vector.extract_strided_slice %0 {offsets = [2, 0, 0], sizes = [1, 32, 128], strides = [1, 1, 1]} : vector<5x32x128xf32> to vector<1x32x128xf32>
    %15 = vector.shape_cast %14 : vector<1x32x128xf32> to vector<32x128xf32>
    %cst_11 = arith.constant dense<0.000000e+00> : vector<32x128xf32>
    %16 = tpu.matmul %1, %15, %cst_11 {dimension_numbers = #tpu.dot_dimension_numbers<[1], [0], [0], [1], [0, 0, 1, 1], [], []>} : vector<32x32xf32>, vector<32x128xf32>, vector<32x128xf32> -> vector<32x128xf32>
    %17 = vector.extract_strided_slice %0 {offsets = [3, 0, 0], sizes = [1, 32, 128], strides = [1, 1, 1]} : vector<5x32x128xf32> to vector<1x32x128xf32>
    %18 = vector.shape_cast %17 : vector<1x32x128xf32> to vector<32x128xf32>
    %cst_12 = arith.constant dense<0.000000e+00> : vector<32x128xf32>
    %19 = tpu.matmul %1, %18, %cst_12 {dimension_numbers = #tpu.dot_dimension_numbers<[1], [0], [0], [1], [0, 0, 1, 1], [], []>} : vector<32x32xf32>, vector<32x128xf32>, vector<32x128xf32> -> vector<32x128xf32>
    %20 = vector.extract_strided_slice %0 {offsets = [4, 0, 0], sizes = [1, 32, 128], strides = [1, 1, 1]} : vector<5x32x128xf32> to vector<1x32x128xf32>
    %21 = vector.shape_cast %20 : vector<1x32x128xf32> to vector<32x128xf32>
    %cst_13 = arith.constant dense<0.000000e+00> : vector<32x128xf32>
    %22 = tpu.matmul %1, %21, %cst_13 {dimension_numbers = #tpu.dot_dimension_numbers<[1], [0], [0], [1], [0, 0, 1, 1], [], []>} : vector<32x32xf32>, vector<32x128xf32>, vector<32x128xf32> -> vector<32x128xf32>
    %23 = vector.shape_cast %10 : vector<32x128xf32> to vector<1x32x128xf32>
    %24 = vector.shape_cast %13 : vector<32x128xf32> to vector<1x32x128xf32>
    %25 = vector.shape_cast %16 : vector<32x128xf32> to vector<1x32x128xf32>
    %26 = vector.shape_cast %19 : vector<32x128xf32> to vector<1x32x128xf32>
    %27 = vector.shape_cast %22 : vector<32x128xf32> to vector<1x32x128xf32>
    %28 = tpu.concatenate %23, %24, %25, %26, %27 in 0 : vector<1x32x128xf32>, vector<1x32x128xf32>, vector<1x32x128xf32>, vector<1x32x128xf32>, vector<1x32x128xf32> -> vector<5x32x128xf32>
    %29 = vector.broadcast %3 : vector<1x32x1xf32> to vector<5x32x128xf32>
    %30 = arith.addf %28, %29 : vector<5x32x128xf32>
    %cst_14 = arith.constant dense<0.000000e+00> : vector<5x32xf32>
    %31 = vector.multi_reduction <add>, %30, %cst_14 [2] : vector<5x32x128xf32> to vector<5x32xf32>
    %32 = vector.shape_cast %31 : vector<5x32xf32> to vector<5x32x1xf32>
    %33 = arith.mulf %30, %30 : vector<5x32x128xf32>
    %cst_15 = arith.constant dense<0.000000e+00> : vector<5x32xf32>
    %34 = vector.multi_reduction <add>, %33, %cst_15 [2] : vector<5x32x128xf32> to vector<5x32xf32>
    %35 = vector.shape_cast %34 : vector<5x32xf32> to vector<5x32x1xf32>
    %cst_16 = arith.constant dense<0.000000e+00> : vector<5x1xf32>
    %36 = vector.multi_reduction <add>, %32, %cst_16 [1] : vector<5x32x1xf32> to vector<5x1xf32>
    %37 = vector.shape_cast %36 : vector<5x1xf32> to vector<5x1x1xf32>
    %cst_17 = arith.constant 2.44140625E-4 : f32
    %38 = vector.broadcast %cst_17 : f32 to vector<5x1x1xf32>
    %39 = arith.mulf %37, %38 : vector<5x1x1xf32>
    %cst_18 = arith.constant dense<0.000000e+00> : vector<5x1xf32>
    %40 = vector.multi_reduction <add>, %35, %cst_18 [1] : vector<5x32x1xf32> to vector<5x1xf32>
    %41 = vector.shape_cast %40 : vector<5x1xf32> to vector<5x1x1xf32>
    %cst_19 = arith.constant 2.44140625E-4 : f32
    %42 = vector.broadcast %cst_19 : f32 to vector<5x1x1xf32>
    %43 = arith.mulf %41, %42 : vector<5x1x1xf32>
    %44 = arith.mulf %39, %39 : vector<5x1x1xf32>
    %45 = arith.subf %43, %44 : vector<5x1x1xf32>
    %cst_20 = arith.constant 0.000000e+00 : f32
    %46 = vector.broadcast %cst_20 : f32 to vector<5x1x1xf32>
    %47 = arith.maximumf %45, %46 : vector<5x1x1xf32>
    %cst_21 = arith.constant 9.99999974E-6 : f32
    %48 = vector.broadcast %cst_21 : f32 to vector<5x1x1xf32>
    %49 = arith.addf %47, %48 : vector<5x1x1xf32>
    %50 = math.rsqrt %49 : vector<5x1x1xf32>
    %51 = vector.broadcast %5 : vector<1x32x1xf32> to vector<5x32x1xf32>
    %52 = vector.broadcast %50 : vector<5x1x1xf32> to vector<5x32x1xf32>
    %53 = arith.mulf %51, %52 : vector<5x32x1xf32>
    %54 = vector.broadcast %39 : vector<5x1x1xf32> to vector<5x32x1xf32>
    %55 = arith.mulf %54, %53 : vector<5x32x1xf32>
    %56 = vector.broadcast %7 : vector<1x32x1xf32> to vector<5x32x1xf32>
    %57 = arith.subf %56, %55 : vector<5x32x1xf32>
    %58 = vector.broadcast %53 : vector<5x32x1xf32> to vector<5x32x128xf32>
    %59 = arith.mulf %30, %58 : vector<5x32x128xf32>
    %60 = vector.broadcast %57 : vector<5x32x1xf32> to vector<5x32x128xf32>
    %61 = arith.addf %59, %60 : vector<5x32x128xf32>
    %cst_22 = arith.constant 2.000000e-01 : f32
    %62 = vector.broadcast %cst_22 : f32 to vector<5x32x128xf32>
    %63 = arith.mulf %62, %61 : vector<5x32x128xf32>
    %64 = arith.maximumf %61, %63 : vector<5x32x128xf32>
    %65 = arith.addf %64, %0 : vector<5x32x128xf32>
    %cst_23 = arith.constant 0.707106769 : f32
    %66 = vector.broadcast %cst_23 : f32 to vector<5x32x128xf32>
    %67 = arith.mulf %65, %66 : vector<5x32x128xf32>
    %c0_24 = arith.constant 0 : index
    %c0_25 = arith.constant 0 : index
    %c0_26 = arith.constant 0 : index
    %68 = vector.load %arg6[%c0_24, %c0_25, %c0_26] : memref<5x32x128xf32, #tpu.memory_space<vmem>>, vector<5x32x128xf32>
    tpu.vector_store %arg6[%c0_24, %c0_25, %c0_26], %67 {strides = array<i32>} : memref<5x32x128xf32, #tpu.memory_space<vmem>>, vector<5x32x128xf32>,
    return
  }
  func.func @transform_0(%arg0: i32) -> (i32, i32, i32) {
    %c0_i32 = arith.constant 0 : i32
    %c0_i32_0 = arith.constant 0 : i32
    %c0_i32_1 = arith.constant 0 : i32
    return %arg0, %c0_i32, %c0_i32_0 : i32, i32, i32
  }
  func.func @transform_1(%arg0: i32) -> (i32, i32) {
    %c0_i32 = arith.constant 0 : i32
    %c0_i32_0 = arith.constant 0 : i32
    %c0_i32_1 = arith.constant 0 : i32
    return %c0_i32, %c0_i32_0 : i32, i32
  }
  func.func @transform_2(%arg0: i32) -> (i32, i32) {
    %c0_i32 = arith.constant 0 : i32
    %c0_i32_0 = arith.constant 0 : i32
    %c0_i32_1 = arith.constant 0 : i32
    return %c0_i32, %c0_i32_0 : i32, i32
  }
  func.func @transform_3(%arg0: i32) -> (i32, i32) {
    %c0_i32 = arith.constant 0 : i32
    %c0_i32_0 = arith.constant 0 : i32
    %c0_i32_1 = arith.constant 0 : i32
    return %c0_i32, %c0_i32_0 : i32, i32
  }
  func.func @transform_4(%arg0: i32) -> (i32, i32) {
    %c0_i32 = arith.constant 0 : i32
    %c0_i32_0 = arith.constant 0 : i32
    %c0_i32_1 = arith.constant 0 : i32
    return %c0_i32, %c0_i32_0 : i32, i32
  }
  func.func @transform_5(%arg0: i32) -> (i32, i32, i32) {
    %c0_i32 = arith.constant 0 : i32
    %c0_i32_0 = arith.constant 0 : i32
    %c0_i32_1 = arith.constant 0 : i32
    return %arg0, %c0_i32, %c0_i32_0 : i32, i32, i32
  }
}

</mosaic_0001>

<bundles_post_ra>
// kernel: tpu_custom_call.1
= control target key start
LH: loop header
LB: loop body
LE: loop exit
PB: predicated region body
PF: predicated region fallthrough
CT: control target
= control target key end

     0   :  { %10 = vsyncpa [#allocation3], 0  ;;  %s1799_s0 = inlined_call_operand.hbm [shape: f32[5,32,128], index: 0, kind: input, shape index: {}]   ;;  %s1800_s1 = inlined_call_operand.vmem [shape: f32[32,32], index: 1, kind: input, shape index: {}]   ;;  %s1801_s2 = inlined_call_operand.vmem [shape: f32[32,1], index: 2, kind: input, shape index: {}]   ;;  %s1802_s3 = inlined_call_operand.vmem [shape: f32[32,1], index: 3, kind: input, shape index: {}]   ;;  %s1803_s4 = inlined_call_operand.vmem [shape: f32[32,1], index: 4, kind: input, shape index: {}]   ;;  %s1804_s5 = inlined_call_operand.hbm [shape: f32[5,32,128], index: 5, kind: output, shape index: {}]  }
   0x1   :  { %11 = vsyncpa [#allocation4], 0  ;;  %s1407_s18 = smov [#allocation2]  }
   0x2   :  { %s17_s19 = sshll.u32 %s1407_s18, 4  ;;  %s18_s19 = int_to_ptr.vmem [resolvable:$true] %s17_s19 }
   0x3   :  { %s1371_s20 = scalar_lea.vmem %s18_s19, 2560  ;;  %p1376_p1 = scmp.lt.s32.totalorder %s18_s19, %s18_s19 }
   0x4   :  { %p1372_p0 = scmp.ne.s32.totalorder %s18_s19, %s1371_s20  ;;  %p1377_p2 = scmp.lt.s32.totalorder %s1371_s20, %s1371_s20 }
   0x6   :  { %p1378_p3 = por %p1377_p2, %p1376_p1 }
   0x8   :  { %p1379_p4 = pnand %p1378_p3, %p1372_p0 }
   0xa   :  { %1382 = shalt.err (!%p1379_p4)
}
   0xb   :  { %s1408_s21 = smov 128   ;;  %s1409_s22 = smov 8  }
   0xc   :  { %23 = dma.hbm_to_vmem [thread:$0]  %s1799_s0, 2560, %s18_s19, [#allocation3], %s1408_s21, %s1408_s21, %s1409_s22  }
   0xd   :  { %1403 = dma.done.wait [#allocation3], 2560  }
   0xe   :  { %1404 = vsyncadd [#allocation3], 4294964736  ;;  %v1410_v0 = vmov 0   ;;  %v38_v1 = vld [vmem:[#allocation2 + $0x18] sm:$0xff]  ;;  %v1448_v3 = vld [vmem:[#allocation2 + $0x10] sm:$0xff]  ;;  %vm71_vm0 = vcmask 261120  }
   0xf   :  { %1334 = vset.pattern.permute.xlu0 %v1410_v0  ;;  %1335 = vset.pattern.permute.xlu1 %v1410_v0  ;;  %v42_v2 = vld [vmem:[#allocation2 + $0x38] sm:$0xff]  ;;  %v41_v4 = vld [vmem:[#allocation2 + $0x30] sm:$0xff]  ;;  %v36_v5 = vld [vmem:[#allocation2 + $0x8] sm:$0xff] }
  0x10   :  { %1251 = vmatprep.subr.mxu0 %v38_v1  ;;  %1265 = vmatprep.subr.mxu1 %v42_v2  ;;  %v40_v6 = vld [vmem:[#allocation2 + $0x28] sm:$0xff]  ;;  %v1452_v7 = vld [vmem:[#allocation2] sm:$0xff]  ;;  %v46_v11 = vld [vmem:[#allocation2 + $0x58] sm:$0xff] }
  0x11   :  { %1252 = vmatpush3.msra.mxu0 %v38_v1  ;;  %1266 = vmatpush3.msra.mxu1 %v42_v2  ;;  %v1454_v8 = vld [vmem:[#allocation2 + $0x20] sm:$0xff]  ;;  %v1466_v10 = vld [vmem:[%s1800_s1 + $0x8] sm:$0xff]  ;;  %v50_v12 = vld [vmem:[#allocation2 + $0x78] sm:$0xff] }
  0x12   :  { %1253 = vmatprep.subr.mxu0 %v1448_v3  ;;  %1267 = vmatprep.subr.mxu1 %v41_v4  ;;  %v1459_v9 = vld [vmem:[%s1800_s1] sm:$0xff]  ;;  %v45_v13 = vld [vmem:[#allocation2 + $0x50] sm:$0xff]  ;;  %v58_v16 = vld [vmem:[%s1800_s1 + $0x18] sm:$0xff] }
  0x13   :  { %1254 = vmatpush3.msra.mxu0 %v1448_v3  ;;  %1268 = vmatpush3.msra.mxu1 %v41_v4  ;;  %v49_v14 = vld [vmem:[#allocation2 + $0x70] sm:$0xff]  ;;  %v44_v17 = vld [vmem:[#allocation2 + $0x48] sm:$0xff]  ;;  %v43_v19 = vld [vmem:[#allocation2 + $0x40] sm:$0xff] }
  0x14   :  { %1255 = vmatprep.subr.mxu0 %v36_v5  ;;  %1269 = vmatprep.subr.mxu1 %v40_v6  ;;  %v57_v15 = vld [vmem:[%s1800_s1 + $0x10] sm:$0xff]  ;;  %v48_v18 = vld [vmem:[#allocation2 + $0x68] sm:$0xff]  ;;  %v47_v20 = vld [vmem:[#allocation2 + $0x60] sm:$0xff] }
  0x15   :  { %1256 = vmatpush3.msra.mxu0 %v36_v5  ;;  %1270 = vmatpush3.msra.mxu1 %v40_v6  ;;  %v54_v21 = vld [vmem:[#allocation2 + $0x98] sm:$0xff]  ;;  %v53_v22 = vld [vmem:[#allocation2 + $0x90] sm:$0xff]  ;;  %v52_v23 = vld [vmem:[#allocation2 + $0x88] sm:$0xff] }
  0x16   :  { %1257 = vmatprep.subr.mxu0 %v1452_v7  ;;  %1271 = vmatprep.subr.mxu1 %v1454_v8  ;;  %v51_v24 = vld [vmem:[#allocation2 + $0x80] sm:$0xff]  ;;  %v61_v26 = vld [vmem:[%s1801_s2 + $0x10] sm:$0xff]  ;;  %v60_v27 = vld [vmem:[%s1801_s2 + $0x8] sm:$0xff] }
  0x17   :  { %1258 = vmatpush3.msra.mxu0 %v1452_v7  ;;  %1259 = vmatprep.mubr.msk.f32.mxu0 %vm71_vm0, %v1459_v9  ;;  %v59_v25 = vld [vmem:[%s1801_s2] sm:$0xff]  ;;  %v62_v28 = vld [vmem:[%s1801_s2 + $0x18] sm:$0xff] }
  0x18   :  { %1272 = vmatpush3.msra.mxu1 %v1454_v8  ;;  %1273 = vmatprep.mubr.msk.f32.mxu1 %vm71_vm0, %v1459_v9 }
  0x19   :  { %1260 = vmatmul.mubr.msk.f32.vlgmr.msra.gmra.mxu0 %vm71_vm0, %v1466_v10  ;;  %1274 = vmatmul.mubr.msk.f32.vlgmr.msra.gmra.mxu1 %vm71_vm0, %v1466_v10 }
  0x1a   :  { %1279 = vmatprep.subr.mxu0 %v46_v11  ;;  %1293 = vmatprep.subr.mxu1 %v50_v12 }
  0x1b   :  { %1280 = vmatpush3.msra.mxu0 %v46_v11  ;;  %1294 = vmatpush3.msra.mxu1 %v50_v12 }
  0x1c   :  { %1281 = vmatprep.subr.mxu0 %v45_v13  ;;  %1295 = vmatprep.subr.mxu1 %v49_v14 }
  0x1d   :  { %1262 = vmatprep.mubr.msk.f32.mxu0 %vm71_vm0, %v57_v15  ;;  %1276 = vmatprep.mubr.msk.f32.mxu1 %vm71_vm0, %v57_v15 }
  0x1e   :  { %1282 = vmatpush3.msra.mxu0 %v45_v13  ;;  %1296 = vmatpush3.msra.mxu1 %v49_v14 }
  0x1f   :  { %1263 = vmatmul.mubr.msk.f32.gmra.mxu0 %vm71_vm0, %v58_v16  ;;  %1277 = vmatmul.mubr.msk.f32.gmra.mxu1 %vm71_vm0, %v58_v16 }
  0x20   :  { %1283 = vmatprep.subr.mxu0 %v44_v17  ;;  %1297 = vmatprep.subr.mxu1 %v48_v18 }
  0x21   :  { %1284 = vmatpush3.msra.mxu0 %v44_v17  ;;  %1298 = vmatpush3.msra.mxu1 %v48_v18 }
  0x22   :  { %1285 = vmatprep.subr.mxu0 %v43_v19  ;;  %1299 = vmatprep.subr.mxu1 %v47_v20 }
  0x23   :  { %1286 = vmatpush3.msra.mxu0 %v43_v19  ;;  %1287 = vmatprep.mubr.msk.f32.mxu0 %vm71_vm0, %v1459_v9 }
  0x24   :  { %1300 = vmatpush3.msra.mxu1 %v47_v20  ;;  %1301 = vmatprep.mubr.msk.f32.mxu1 %vm71_vm0, %v1459_v9 }
  0x25   :  { %1288 = vmatmul.mubr.msk.f32.vlgmr.msra.gmra.mxu0 %vm71_vm0, %v1466_v10  ;;  %1302 = vmatmul.mubr.msk.f32.vlgmr.msra.gmra.mxu1 %vm71_vm0, %v1466_v10 }
  0x26   :  { %1307 = vmatprep.subr.mxu0 %v54_v21  ;;  %1321 = vmatprep.subr.mxu1 %v54_v21 }
  0x27   :  { %1308 = vmatpush3.msra.mxu0 %v54_v21  ;;  %1325 = vmatpush3.msra.mxu1 %v54_v21 }
  0x28   :  { %1309 = vmatprep.subr.mxu0 %v53_v22  ;;  %1322 = vmatprep.subr.mxu1 %v53_v22 }
  0x29   :  { %1290 = vmatprep.mubr.msk.f32.mxu0 %vm71_vm0, %v57_v15  ;;  %1304 = vmatprep.mubr.msk.f32.mxu1 %vm71_vm0, %v57_v15 }
  0x2a   :  { %1310 = vmatpush3.msra.mxu0 %v53_v22  ;;  %1326 = vmatpush3.msra.mxu1 %v53_v22 }
  0x2b   :  { %1291 = vmatmul.mubr.msk.f32.gmra.mxu0 %vm71_vm0, %v58_v16  ;;  %1305 = vmatmul.mubr.msk.f32.gmra.mxu1 %vm71_vm0, %v58_v16 }
  0x2c   :  { %1311 = vmatprep.subr.mxu0 %v52_v23  ;;  %1323 = vmatprep.subr.mxu1 %v52_v23 }
  0x2d   :  { %1312 = vmatpush3.msra.mxu0 %v52_v23  ;;  %1327 = vmatpush3.msra.mxu1 %v52_v23 }
  0x2e   :  { %1313 = vmatprep.subr.mxu0 %v51_v24  ;;  %1324 = vmatprep.subr.mxu1 %v51_v24 }
  0x2f   :  { %1314 = vmatpush3.msra.mxu0 %v51_v24  ;;  %1328 = vmatpush3.msra.mxu1 %v51_v24 }
  0x30   :  { %1315 = vmatprep.mubr.msk.f32.mxu0 %vm71_vm0, %v1459_v9  ;;  %1318 = vmatprep.mubr.msk.f32.mxu1 %vm71_vm0, %v57_v15 }
  0x31   :  { %1316 = vmatmul.mubr.msk.f32.vlgmr.msra.gmra.mxu0 %vm71_vm0, %v1466_v10  ;;  %1319 = vmatmul.mubr.msk.f32.vlgmr.msra.gmra.mxu1 %vm71_vm0, %v58_v16 }
  0x32   :  { %511 = vperm.xlu0 %1334, %v59_v25   ;;  %521 = vperm.xlu1 %1335, %v61_v26  }
  0x36   :  { %516 = vperm.xlu0 %1334, %v60_v27   ;;  %526 = vperm.xlu1 %1335, %v62_v28  }
  0xad   :  { %v1518_v29 = vpop.permute.xlu0 %511  ;;  %v1538_v39 = vpop.permute.xlu1 %521 }
  0xb1   :  { %v1520_v30 = vpop.permute.xlu0 %516  ;;  %v1548_v46 = vpop.permute.xlu1 %526 }
  0xd9   :  { %v1261_v31 = vpop.f32.mrf.mxu0  ;;  %v1275_v32 = vpop.f32.mrf.mxu1 }
  0xda   :  { %v1523_v33 = vadd.f32 %v1261_v31, %v1520_v30  ;;  %v1526_v34 = vadd.f32 %v1275_v32, %v1520_v30 }
  0xdb   :  { %v150_v35 = vpop.f32.mrf.mxu0  ;;  %v235_v36 = vpop.f32.mrf.mxu1 }
  0xdc   :  { %559 = vadd.xlane.f32.xlu0 %v1526_v34  ;;  %551 = vadd.xlane.f32.xlu1 %v1523_v33  ;;  %v1531_v37 = vadd.f32 %v1518_v29, %v150_v35  ;;  %v1534_v38 = vadd.f32 %v1518_v29, %v235_v36  ;;  %v590_v40 = vmul.f32 %v1523_v33, %v1523_v33 }
  0xdd   :  { %v594_v44 = vmul.f32 %v1526_v34, %v1526_v34 }
  0xde   :  { %v589_v41 = vmul.f32 %v1531_v37, %v1531_v37  ;;  %v593_v45 = vmul.f32 %v1534_v38, %v1534_v38 }
  0xdf   :  { %v1264_v42 = vpop.f32.mrf.mxu0  ;;  %v1278_v43 = vpop.f32.mrf.mxu1 }
  0xe0   :  { %557 = vadd.xlane.f32.xlu1 %v1534_v38  ;;  %549 = vadd.xlane.f32.xlu0 %v1531_v37  ;;  %v1554_v50 = vadd.f32 %v1264_v42, %v1548_v46  ;;  %v1562_v52 = vadd.f32 %v1278_v43, %v1548_v46 }
  0xe1   :  { %v160_v47 = vpop.f32.mrf.mxu0  ;;  %v245_v48 = vpop.f32.mrf.mxu1 }
  0xe2   :  { %v1551_v49 = vadd.f32 %v1538_v39, %v245_v48  ;;  %v1557_v51 = vadd.f32 %v1538_v39, %v160_v47  ;;  %v592_v59 = vmul.f32 %v1554_v50, %v1554_v50  ;;  %v596_v62 = vmul.f32 %v1562_v52, %v1562_v52 }
  0xe4   :  { %611 = vadd.xlane.f32.xlu0 %v590_v40  ;;  %609 = vadd.xlane.f32.xlu1 %v589_v41  ;;  %v591_v53 = vmul.f32 %v1557_v51, %v1557_v51  ;;  %v595_v55 = vmul.f32 %v1551_v49, %v1551_v49 }
  0xe5   :  { %v1289_v54 = vpop.f32.mrf.mxu0  ;;  %v1303_v56 = vpop.f32.mrf.mxu1 }
  0xe6   :  { %v1583_v63 = vadd.f32 %v1289_v54, %v1520_v30  ;;  %v1589_v2 = vadd.f32 %v1303_v56, %v1520_v30 }
  0xe7   :  { %v320_v57 = vpop.f32.mrf.mxu0  ;;  %v405_v60 = vpop.f32.mrf.mxu1 }
  0xe8   :  { %619 = vadd.xlane.f32.xlu0 %v594_v44  ;;  %617 = vadd.xlane.f32.xlu1 %v593_v45  ;;  %v1571_v58 = vadd.f32 %v1518_v29, %v320_v57  ;;  %v1577_v61 = vadd.f32 %v1518_v29, %v405_v60  ;;  %v598_v10 = vmul.f32 %v1583_v63, %v1583_v63 }
  0xe9   :  { %v602_v14 = vmul.f32 %v1589_v2, %v1589_v2 }
  0xea   :  { %v597_v0 = vmul.f32 %v1571_v58, %v1571_v58  ;;  %v601_v4 = vmul.f32 %v1577_v61, %v1577_v61 }
  0xeb   :  { %v1292_v1 = vpop.f32.mrf.mxu0  ;;  %v1306_v5 = vpop.f32.mrf.mxu1 }
  0xec   :  { %561 = vadd.xlane.f32.xlu1 %v1551_v49  ;;  %555 = vadd.xlane.f32.xlu0 %v1554_v50  ;;  %v1601_v12 = vadd.f32 %v1306_v5, %v1548_v46  ;;  %v1610_v15 = vadd.f32 %v1292_v1, %v1548_v46 }
  0xed   :  { %v330_v6 = vpop.f32.mrf.mxu0  ;;  %v415_v11 = vpop.f32.mrf.mxu1 }
  0xee   :  { %v1595_v9 = vadd.f32 %v1538_v39, %v330_v6  ;;  %v1604_v13 = vadd.f32 %v1538_v39, %v415_v11  ;;  %v604_v16 = vmul.f32 %v1601_v12, %v1601_v12  ;;  %v600_v19 = vmul.f32 %v1610_v15, %v1610_v15 }
  0xf0   :  { %563 = vadd.xlane.f32.xlu0 %v1562_v52  ;;  %613 = vadd.xlane.f32.xlu1 %v591_v53  ;;  %v599_v17 = vmul.f32 %v1595_v9, %v1595_v9  ;;  %v603_v20 = vmul.f32 %v1604_v13, %v1604_v13 }
  0xf1   :  { %v1317_v18 = vpop.f32.mrf.mxu0  ;;  %v1320_v21 = vpop.f32.mrf.mxu1 }
  0xf2   :  { %v1623_v23 = vadd.f32 %v1317_v18, %v1520_v30  ;;  %v1631_v26 = vadd.f32 %v1320_v21, %v1548_v46 }
  0xf3   :  { %v490_v22 = vpop.f32.mrf.mxu0  ;;  %v500_v25 = vpop.f32.mrf.mxu1 }
  0xf4   :  { %553 = vadd.xlane.f32.xlu0 %v1557_v51  ;;  %621 = vadd.xlane.f32.xlu1 %v595_v55  ;;  %v1626_v24 = vadd.f32 %v1518_v29, %v490_v22  ;;  %v1634_v27 = vadd.f32 %v1538_v39, %v500_v25  ;;  %v606_v28 = vmul.f32 %v1623_v23, %v1623_v23 }
  0xf5   :  { %v608_v31 = vmul.f32 %v1631_v26, %v1631_v26 }
  0xf6   :  { %v605_v29 = vmul.f32 %v1626_v24, %v1626_v24  ;;  %v607_v30 = vmul.f32 %v1634_v27, %v1634_v27 }
  0xf8   :  { %615 = vadd.xlane.f32.xlu0 %v592_v59  ;;  %565 = vadd.xlane.f32.xlu1 %v1571_v58 }
  0xfc   :  { %623 = vadd.xlane.f32.xlu0 %v596_v62  ;;  %573 = vadd.xlane.f32.xlu1 %v1577_v61 }
 0x100   :  { %567 = vadd.xlane.f32.xlu0 %v1583_v63  ;;  %625 = vadd.xlane.f32.xlu1 %v597_v0 }
 0x104   :  { %575 = vadd.xlane.f32.xlu0 %v1589_v2  ;;  %633 = vadd.xlane.f32.xlu1 %v601_v4 }
 0x108   :  { %627 = vadd.xlane.f32.xlu0 %v598_v10  ;;  %569 = vadd.xlane.f32.xlu1 %v1595_v9 }
 0x10c   :  { %635 = vadd.xlane.f32.xlu0 %v602_v14  ;;  %577 = vadd.xlane.f32.xlu1 %v1604_v13 }
 0x110   :  { %571 = vadd.xlane.f32.xlu0 %v1610_v15  ;;  %639 = vadd.xlane.f32.xlu1 %v604_v16 }
 0x114   :  { %579 = vadd.xlane.f32.xlu0 %v1601_v12  ;;  %629 = vadd.xlane.f32.xlu1 %v599_v17 }
 0x118   :  { %631 = vadd.xlane.f32.xlu0 %v600_v19  ;;  %637 = vadd.xlane.f32.xlu1 %v603_v20 }
 0x11c   :  { %583 = vadd.xlane.f32.xlu0 %v1623_v23  ;;  %581 = vadd.xlane.f32.xlu1 %v1626_v24 }
 0x120   :  { %587 = vadd.xlane.f32.xlu0 %v1631_v26  ;;  %585 = vadd.xlane.f32.xlu1 %v1634_v27 }
 0x124   :  { %643 = vadd.xlane.f32.xlu0 %v606_v28  ;;  %641 = vadd.xlane.f32.xlu1 %v605_v29 }
 0x128   :  { %645 = vadd.xlane.f32.xlu0 %v607_v30 }
 0x12c   :  { %647 = vadd.xlane.f32.xlu0 %v608_v31 }
 0x165   :  { %v560_v32 = vpop.xlane.xlu0 %559  ;;  %v552_v35 = vpop.xlane.xlu1 %551 }
 0x169   :  { %v558_v36 = vpop.xlane.xlu1 %557  ;;  %v550_v39 = vpop.xlane.xlu0 %549 }
 0x16a   :  { %v658_v46 = vadd.f32 %v560_v32, %v558_v36  ;;  %v649_v55 = vadd.f32 %v552_v35, %v550_v39 }
 0x16d   :  { %v612_v40 = vpop.xlane.xlu0 %611  ;;  %v610_v41 = vpop.xlane.xlu1 %609 }
 0x16e   :  { %v699_v60 = vadd.f32 %v612_v40, %v610_v41 }
 0x171   :  { %v620_v42 = vpop.xlane.xlu0 %619  ;;  %v618_v43 = vpop.xlane.xlu1 %617 }
 0x172   :  { %v708_v11 = vadd.f32 %v620_v42, %v618_v43 }
 0x175   :  { %v562_v44 = vpop.xlane.xlu1 %561  ;;  %v556_v45 = vpop.xlane.xlu0 %555 }
 0x176   :  { %v659_v47 = vadd.f32 %v658_v46, %v562_v44 }
 0x179   :  { %v564_v48 = vpop.xlane.xlu0 %563  ;;  %v614_v53 = vpop.xlane.xlu1 %613 }
 0x17a   :  { %v660_v54 = vadd.f32 %v659_v47, %v564_v48  ;;  %v700_v4 = vadd.f32 %v699_v60, %v614_v53 }
 0x17c   :  { %v661_v56 = vrot.slane %v660_v54, 4 }
 0x17d   :  { %v554_v57 = vpop.xlane.xlu0 %553  ;;  %v622_v59 = vpop.xlane.xlu1 %621 }
 0x17e   :  { %v662_v62 = vadd.f32 %v661_v56, %v660_v54  ;;  %v650_v0 = vadd.f32 %v649_v55, %v554_v57  ;;  %v709_v19 = vadd.f32 %v708_v11, %v622_v59 }
 0x180   :  { %v663_v1 = vrot.slane %v662_v62, 2  ;;  %v651_v5 = vadd.f32 %v650_v0, %v556_v45 }
 0x181   :  { %v616_v6 = vpop.xlane.xlu0 %615  ;;  %v566_v10 = vpop.xlane.xlu1 %565 }
 0x182   :  { %v652_v14 = vrot.slane %v651_v5, 4  ;;  %v701_v16 = vadd.f32 %v700_v4, %v616_v6  ;;  %v664_v17 = vadd.f32 %v663_v1, %v662_v62 }
 0x184   :  { %v653_v18 = vadd.f32 %v652_v14, %v651_v5  ;;  %v702_v20 = vrot.slane %v701_v16, 4  ;;  %v665_v30 = vrot.slane %v664_v17, 1 }
 0x185   :  { %v624_v21 = vpop.xlane.xlu0 %623  ;;  %v574_v22 = vpop.xlane.xlu1 %573 }
 0x186   :  { %v654_v25 = vrot.slane %v653_v18, 2  ;;  %v703_v28 = vadd.f32 %v702_v20, %v701_v16  ;;  %v710_v29 = vadd.f32 %v709_v19, %v624_v21  ;;  %v666_v43 = vadd.f32 %v665_v30, %v664_v17 }
 0x188   :  { %v655_v31 = vadd.f32 %v654_v25, %v653_v18  ;;  %v704_v32 = vrot.slane %v703_v28, 2  ;;  %v711_v35 = vrot.slane %v710_v29, 4  ;;  %v1648_v56 = vmul.f32 0.00024414063, %v666_v43 }
 0x189   :  { %v568_v36 = vpop.xlane.xlu0 %567  ;;  %v626_v39 = vpop.xlane.xlu1 %625 }
 0x18a   :  { %v656_v40 = vrot.slane %v655_v31, 1  ;;  %v705_v41 = vadd.f32 %v704_v32, %v703_v28  ;;  %v712_v42 = vadd.f32 %v711_v35, %v710_v29  ;;  %v750_v6 = vmul.f32 %v1648_v56, %v1648_v56 }
 0x18b   :  { %v667_v19 = vadd.f32 %v568_v36, %v566_v10 }
 0x18c   :  { %v657_v44 = vadd.f32 %v656_v40, %v655_v31  ;;  %v706_v45 = vrot.slane %v705_v41, 1  ;;  %v713_v46 = vrot.slane %v712_v42, 2 }
 0x18d   :  { %v576_v47 = vpop.xlane.xlu0 %575  ;;  %v634_v48 = vpop.xlane.xlu1 %633 }
 0x18e   :  { %v1646_v53 = vmul.f32 0.00024414063, %v657_v44  ;;  %v707_v54 = vadd.f32 %v706_v45, %v705_v41  ;;  %v714_v55 = vadd.f32 %v713_v46, %v712_v42  ;;  %v676_v30 = vadd.f32 %v576_v47, %v574_v22 }
 0x190   :  { %v749_v57 = vmul.f32 %v1646_v53, %v1646_v53  ;;  %v744_v59 = vmul.f32 0.00024414063, %v707_v54  ;;  %v715_v60 = vrot.slane %v714_v55, 1 }
 0x191   :  { %v628_v62 = vpop.xlane.xlu0 %627  ;;  %v570_v0 = vpop.xlane.xlu1 %569 }
 0x192   :  { %v754_v1 = vsub.f32 %v744_v59, %v749_v57  ;;  %v716_v4 = vadd.f32 %v715_v60, %v714_v55  ;;  %v668_v21 = vadd.f32 %v667_v19, %v570_v0  ;;  %v717_v42 = vadd.f32 %v628_v62, %v626_v39  ;;  %v1657_v39 = vld [vmem:[%s1802_s3 + $0x8] sm:$0xff] }
 0x194   :  { %v759_v5 = vmax.f32 %v754_v1, 0.0  ;;  %v745_v11 = vmul.f32 0.00024414063, %v716_v4 }
 0x195   :  { %v636_v14 = vpop.xlane.xlu0 %635  ;;  %v578_v16 = vpop.xlane.xlu1 %577 }
 0x196   :  { %v764_v17 = vadd.f32 1e-05, %v759_v5  ;;  %v755_v18 = vsub.f32 %v745_v11, %v750_v6  ;;  %v677_v32 = vadd.f32 %v676_v30, %v578_v16  ;;  %v726_v45 = vadd.f32 %v636_v14, %v634_v48  ;;  %v1662_v48 = vld [vmem:[%s1802_s3] sm:$0xff] }
 0x198   :  { %1336 = vrsqrt.f32 %v764_v17  ;;  %v760_v20 = vmax.f32 %v755_v18, 0.0 }
 0x199   :  { %v572_v25 = vpop.xlane.xlu0 %571  ;;  %v640_v28 = vpop.xlane.xlu1 %639 }
 0x19a   :  { %v765_v29 = vadd.f32 1e-05, %v760_v20  ;;  %v669_v31 = vadd.f32 %v668_v21, %v572_v25 }
 0x19c   :  { %1338 = vrsqrt.f32 %v765_v29  ;;  %v670_v35 = vrot.slane %v669_v31, 4 }
 0x19d   :  { %v580_v40 = vpop.xlane.xlu0 %579  ;;  %v630_v41 = vpop.xlane.xlu1 %629 }
 0x19e   :  { %v671_v43 = vadd.f32 %v670_v35, %v669_v31  ;;  %v678_v44 = vadd.f32 %v677_v32, %v580_v40  ;;  %v718_v10 = vadd.f32 %v717_v42, %v630_v41 }
 0x1a0   :  { %v672_v46 = vrot.slane %v671_v43, 2  ;;  %v679_v54 = vrot.slane %v678_v44, 4 }
 0x1a1   :  { %v632_v36 = vpop.xlane.xlu0 %631  ;;  %v638_v55 = vpop.xlane.xlu1 %637 }
 0x1a2   :  { %v673_v57 = vadd.f32 %v672_v46, %v671_v43  ;;  %v680_v59 = vadd.f32 %v679_v54, %v678_v44  ;;  %v719_v60 = vadd.f32 %v718_v10, %v632_v36  ;;  %v727_v0 = vadd.f32 %v726_v45, %v638_v55  ;;  %v1681_v10 = vld [vmem:[%s1802_s3 + $0x18] sm:$0xff] }
 0x1a4   :  { %v674_v22 = vrot.slane %v673_v57, 1  ;;  %v681_v47 = vrot.slane %v680_v59, 2  ;;  %v720_v1 = vrot.slane %v719_v60, 4  ;;  %v728_v4 = vadd.f32 %v727_v0, %v640_v28  ;;  %v1671_v28 = vld [vmem:[%s1802_s3 + $0x10] sm:$0xff] }
 0x1a5   :  { %v1337_v62 = vpop.eup %1336  ;;  %v584_v5 = vpop.xlane.xlu0 %583 }
 0x1a6   :  { %v582_v6 = vpop.xlane.xlu1 %581  ;;  %v682_v11 = vadd.f32 %v681_v47, %v680_v59  ;;  %v721_v14 = vadd.f32 %v720_v1, %v719_v60  ;;  %v729_v16 = vrot.slane %v728_v4, 4  ;;  %v1665_v17 = vmul.f32 %v1337_v62, %v1657_v39 }
 0x1a7   :  { %v774_v18 = vmul.f32 %v1337_v62, %v1662_v48  ;;  %v675_v19 = vadd.f32 %v674_v22, %v673_v57  ;;  %v685_v30 = vadd.f32 %v584_v5, %v582_v6  ;;  %v776_v44 = vmul.f32 %v1337_v62, %v1671_v28 }
 0x1a8   :  { %v683_v20 = vrot.slane %v682_v11, 1  ;;  %v722_v21 = vrot.slane %v721_v14, 2  ;;  %v730_v25 = vadd.f32 %v729_v16, %v728_v4  ;;  %841 = vperm.xlu0 %1334, %v1665_v17   ;;  %v777_v1 = vmul.f32 %v1337_v62, %v1681_v10 }
 0x1a9   :  { %v1339_v29 = vpop.eup %1338  ;;  %836 = vperm.xlu1 %1335, %v774_v18   ;;  %v588_v31 = vpop.xlane.xlu0 %587  ;;  %v1676_v45 = vmul.f32 0.00024414063, %v675_v19  ;;  %v794_v4 = vmul.f32 %v774_v18, %v1646_v53 }
 0x1aa   :  { %v586_v32 = vpop.xlane.xlu1 %585  ;;  %v684_v35 = vadd.f32 %v683_v20, %v682_v11  ;;  %v723_v40 = vadd.f32 %v722_v21, %v721_v14  ;;  %v731_v41 = vrot.slane %v730_v25, 2  ;;  %v778_v43 = vmul.f32 %v1339_v29, %v1662_v48  ;;  %v1693_v14 = vld [vmem:[%s1803_s4] sm:$0xff] }
 0x1ab   :  { %v686_v42 = vadd.f32 %v685_v30, %v586_v32  ;;  %v780_v47 = vmul.f32 %v1339_v29, %v1671_v28  ;;  %v751_v6 = vmul.f32 %v1676_v45, %v1676_v45  ;;  %v779_v30 = vmul.f32 %v1339_v29, %v1657_v39 }
 0x1ac   :  { %v724_v46 = vrot.slane %v723_v40, 1  ;;  %v732_v54 = vadd.f32 %v731_v41, %v730_v25  ;;  %856 = vperm.xlu0 %1334, %v778_v43   ;;  %v1683_v57 = vmul.f32 0.00024414063, %v684_v35  ;;  %v814_v25 = vsub.f32 %v1693_v14, %v794_v4 }
 0x1ad   :  { %v687_v36 = vadd.f32 %v686_v42, %v588_v31  ;;  %846 = vperm.xlu1 %1335, %v776_v44   ;;  %v644_v55 = vpop.xlane.xlu0 %643  ;;  %v796_v31 = vmul.f32 %v776_v44, %v1646_v53  ;;  %v1703_v42 = vld [vmem:[%s1803_s4 + $0x10] sm:$0xff]  ;;  %v798_v44 = vmul.f32 %v778_v43, %v1648_v56  ;;  %v800_v43 = vmul.f32 %v780_v47, %v1648_v56 }
 0x1ae   :  { %v725_v59 = vadd.f32 %v724_v46, %v723_v40  ;;  %v733_v60 = vrot.slane %v732_v54, 1  ;;  %v642_v22 = vpop.xlane.xlu1 %641  ;;  %v752_v62 = vmul.f32 %v1683_v57, %v1683_v57 }
 0x1af   :  { %v688_v0 = vrot.slane %v687_v36, 4  ;;  %v735_v18 = vadd.f32 %v644_v55, %v642_v22 }
 0x1b0   :  { %v746_v5 = vmul.f32 0.00024414063, %v725_v59  ;;  %v734_v11 = vadd.f32 %v733_v60, %v732_v54  ;;  %866 = vperm.xlu0 %1334, %v780_v47   ;;  %v816_v59 = vsub.f32 %v1703_v42, %v796_v31  ;;  %v781_v60 = vmul.f32 %v1339_v29, %v1681_v10 }
 0x1b1   :  { %v689_v16 = vadd.f32 %v688_v0, %v687_v36  ;;  %851 = vperm.xlu1 %1335, %v777_v1   ;;  %v646_v19 = vpop.xlane.xlu0 %645  ;;  %v795_v0 = vmul.f32 %v1665_v17, %v1646_v53  ;;  %v797_v17 = vmul.f32 %v777_v1, %v1646_v53  ;;  %v799_v31 = vmul.f32 %v779_v30, %v1648_v56 }
 0x1b2   :  { %v756_v20 = vsub.f32 %v746_v5, %v751_v6  ;;  %v747_v21 = vmul.f32 0.00024414063, %v734_v11  ;;  %v736_v41 = vadd.f32 %v735_v18, %v646_v19  ;;  %v1713_v5 = vld [vmem:[%s1803_s4 + $0x8] sm:$0xff]  ;;  %v818_v19 = vsub.f32 %v1693_v14, %v798_v44 }
 0x1b3   :  { %v690_v40 = vrot.slane %v689_v16, 2  ;;  %v815_v29 = vsub.f32 %v1713_v5, %v795_v0  ;;  %v820_v18 = vsub.f32 %v1703_v42, %v800_v43  ;;  %v819_v1 = vsub.f32 %v1713_v5, %v799_v31 }
 0x1b4   :  { %v761_v32 = vmax.f32 %v756_v20, 0.0  ;;  %v757_v35 = vsub.f32 %v747_v21, %v752_v62  ;;  %956 = vperm.xlu0 %1334, %v814_v25   ;;  %v1722_v62 = vld [vmem:[%s1803_s4 + $0x18] sm:$0xff]  ;;  %s1411_s4 = smov [#allocation5]  }
 0x1b5   :  { %861 = vperm.xlu1 %1335, %v779_v30   ;;  %v648_v46 = vpop.xlane.xlu0 %647  ;;  %v691_v22 = vadd.f32 %v690_v40, %v689_v16  ;;  %v817_v25 = vsub.f32 %v1722_v62, %v797_v17  ;;  %s1179_s29 = sshll.u32 %s1411_s4, 4  ;;  %s1180_s29 = int_to_ptr.vmem [resolvable:$true] %s1179_s29 }
 0x1b6   :  { %v766_v54 = vadd.f32 1e-05, %v761_v32  ;;  %v762_v36 = vmax.f32 %v757_v35, 0.0  ;;  %v737_v55 = vadd.f32 %v736_v41, %v648_v46  ;;  %v801_v35 = vmul.f32 %v781_v60, %v1648_v56  ;;  %s1383_s30 = scalar_lea.vmem %s1180_s29, 2560  ;;  %p1388_p6 = scmp.lt.s32.totalorder %s1180_s29, %s1180_s29 }
 0x1b7   :  { %v692_v20 = vrot.slane %v691_v22, 1  ;;  %p1384_p5 = scmp.ne.s32.totalorder %s1180_s29, %s1383_s30  ;;  %p1389_p7 = scmp.lt.s32.totalorder %s1383_s30, %s1383_s30 }
 0x1b8   :  { %1340 = vrsqrt.f32 %v766_v54  ;;  %v738_v4 = vrot.slane %v737_v55, 4  ;;  %966 = vperm.xlu0 %1334, %v816_v59   ;;  %v767_v6 = vadd.f32 1e-05, %v762_v36  ;;  %v821_v36 = vsub.f32 %v1722_v62, %v801_v35 }
 0x1b9   :  { %871 = vperm.xlu1 %1335, %v781_v60   ;;  %v693_v47 = vadd.f32 %v692_v20, %v691_v22  ;;  %p1390_p8 = por %p1389_p7, %p1388_p6 }
 0x1ba   :  { %v739_v11 = vadd.f32 %v738_v4, %v737_v55  ;;  %1342 = vrsqrt.f32 %v767_v6 }
 0x1bb   :  { %v1729_v40 = vmul.f32 0.00024414063, %v693_v47  ;;  %p1391_p9 = pnand %p1390_p8, %p1384_p5 }
 0x1bc   :  { %v740_v16 = vrot.slane %v739_v11, 2  ;;  %976 = vperm.xlu0 %1334, %v818_v19  }
 0x1bd   :  { %961 = vperm.xlu1 %1335, %v815_v29   ;;  %v753_v30 = vmul.f32 %v1729_v40, %v1729_v40 }
 0x1be   :  { %v741_v21 = vadd.f32 %v740_v16, %v739_v11 }
 0x1c0   :  { %v742_v32 = vrot.slane %v741_v21, 1  ;;  %986 = vperm.xlu0 %1334, %v820_v18  }
 0x1c1   :  { %971 = vperm.xlu1 %1335, %v817_v25  }
 0x1c2   :  { %v743_v53 = vadd.f32 %v742_v32, %v741_v21 }
 0x1c4   :  { %v748_v46 = vmul.f32 0.00024414063, %v743_v53 }
 0x1c5   :  { %v1341_v41 = vpop.eup %1340  ;;  %981 = vperm.xlu1 %1335, %v819_v1  }
 0x1c6   :  { %v782_v54 = vmul.f32 %v1341_v41, %v1662_v48  ;;  %v758_v55 = vsub.f32 %v748_v46, %v753_v30  ;;  %v784_v59 = vmul.f32 %v1341_v41, %v1671_v28  ;;  %v783_v56 = vmul.f32 %v1341_v41, %v1657_v39 }
 0x1c7   :  { %v1343_v44 = vpop.eup %1342  ;;  %v785_v22 = vmul.f32 %v1341_v41, %v1681_v10 }
 0x1c8   :  { %876 = vperm.xlu0 %1334, %v782_v54   ;;  %v763_v60 = vmax.f32 %v758_v55, 0.0  ;;  %v786_v0 = vmul.f32 %v1343_v44, %v1662_v48  ;;  %v788_v6 = vmul.f32 %v1343_v44, %v1671_v28  ;;  %v802_v11 = vmul.f32 %v782_v54, %v1676_v45 }
 0x1c9   :  { %991 = vperm.xlu1 %1335, %v821_v36   ;;  %v787_v19 = vmul.f32 %v1343_v44, %v1657_v39  ;;  %v804_v43 = vmul.f32 %v784_v59, %v1676_v45  ;;  %v789_v17 = vmul.f32 %v1343_v44, %v1681_v10  ;;  %v803_v20 = vmul.f32 %v783_v56, %v1676_v45 }
 0x1ca   :  { %v768_v4 = vadd.f32 1e-05, %v763_v60  ;;  %v822_v29 = vsub.f32 %v1693_v14, %v802_v11  ;;  %v806_v21 = vmul.f32 %v786_v0, %v1683_v57  ;;  %v805_v25 = vmul.f32 %v785_v22, %v1676_v45 }
 0x1cb   :  { %v824_v16 = vsub.f32 %v1703_v42, %v804_v43  ;;  %v823_v18 = vsub.f32 %v1713_v5, %v803_v20  ;;  %v808_v47 = vmul.f32 %v788_v6, %v1683_v57  ;;  %v807_v53 = vmul.f32 %v787_v19, %v1683_v57 }
 0x1cc   :  { %886 = vperm.xlu0 %1334, %v784_v59   ;;  %1344 = vrsqrt.f32 %v768_v4  ;;  %v826_v31 = vsub.f32 %v1693_v14, %v806_v21  ;;  %v825_v32 = vsub.f32 %v1722_v62, %v805_v25  ;;  %v809_v46 = vmul.f32 %v789_v17, %v1683_v57 }
 0x1cd   :  { %881 = vperm.xlu1 %1335, %v783_v56   ;;  %v828_v1 = vsub.f32 %v1703_v42, %v808_v47  ;;  %v827_v41 = vsub.f32 %v1713_v5, %v807_v53 }
 0x1ce   :  { %v829_v54 = vsub.f32 %v1722_v62, %v809_v46 }
 0x1d0   :  { %896 = vperm.xlu0 %1334, %v786_v0  }
 0x1d1   :  { %891 = vperm.xlu1 %1335, %v785_v22  }
 0x1d4   :  { %906 = vperm.xlu0 %1334, %v788_v6  }
 0x1d5   :  { %901 = vperm.xlu1 %1335, %v787_v19  }
 0x1d8   :  { %996 = vperm.xlu0 %1334, %v822_v29  }
 0x1d9   :  { %911 = vperm.xlu1 %1335, %v789_v17   ;;  %v1345_v35 = vpop.eup %1344 }
 0x1da   :  { %v790_v45 = vmul.f32 %v1345_v35, %v1662_v48  ;;  %v792_v36 = vmul.f32 %v1345_v35, %v1671_v28  ;;  %v791_v55 = vmul.f32 %v1345_v35, %v1657_v39  ;;  %v793_v44 = vmul.f32 %v1345_v35, %v1681_v10 }
 0x1dc   :  { %1006 = vperm.xlu0 %1334, %v824_v16   ;;  %v810_v30 = vmul.f32 %v790_v45, %v1729_v40  ;;  %v812_v57 = vmul.f32 %v792_v36, %v1729_v40  ;;  %v811_v48 = vmul.f32 %v791_v55, %v1729_v40  ;;  %v813_v60 = vmul.f32 %v793_v44, %v1729_v40 }
 0x1dd   :  { %1001 = vperm.xlu1 %1335, %v823_v18  }
 0x1de   :  { %v830_v59 = vsub.f32 %v1693_v14, %v810_v30  ;;  %v832_v56 = vsub.f32 %v1703_v42, %v812_v57  ;;  %v831_v28 = vsub.f32 %v1713_v5, %v811_v48  ;;  %v833_v39 = vsub.f32 %v1722_v62, %v813_v60 }
 0x1e0   :  { %1016 = vperm.xlu0 %1334, %v826_v31  }
 0x1e1   :  { %1011 = vperm.xlu1 %1335, %v825_v32  }
 0x1e4   :  { %1026 = vperm.xlu0 %1334, %v828_v1  }
 0x1e5   :  { %1021 = vperm.xlu1 %1335, %v827_v41  }
 0x1e8   :  { %916 = vperm.xlu0 %1334, %v790_v45  }
 0x1e9   :  { %1031 = vperm.xlu1 %1335, %v829_v54  }
 0x1ec   :  { %926 = vperm.xlu0 %1334, %v792_v36  }
 0x1ed   :  { %921 = vperm.xlu1 %1335, %v791_v55  }
 0x1f0   :  { %1036 = vperm.xlu0 %1334, %v830_v59  }
 0x1f1   :  { %931 = vperm.xlu1 %1335, %v793_v44  }
 0x1f4   :  { %1046 = vperm.xlu0 %1334, %v832_v56  }
 0x1f5   :  { %1041 = vperm.xlu1 %1335, %v831_v28  }
 0x1f9   :  { %1051 = vperm.xlu1 %1335, %v833_v39  }
 0x223   :  { %v842_v14 = vpop.permute.xlu0 %841 }
 0x224   :  { %v837_v0 = vpop.permute.xlu1 %836  ;;  %v935_v62 = vmul.f32 %v842_v14, %v1523_v33 }
 0x225   :  { %v934_v11 = vmul.f32 %v837_v0, %v1531_v37 }
 0x227   :  { %v857_v22 = vpop.permute.xlu0 %856 }
 0x228   :  { %v847_v4 = vpop.permute.xlu1 %846  ;;  %v938_v21 = vmul.f32 %v857_v22, %v1534_v38  ;;  %v1347_v22 = vld [vmem:[#allocation2 + $0x30] sm:$0xff] }
 0x229   :  { %v936_v5 = vmul.f32 %v847_v4, %v1557_v51 }
 0x22b   :  { %v867_v10 = vpop.permute.xlu0 %866 }
 0x22c   :  { %v852_v6 = vpop.permute.xlu1 %851  ;;  %v940_v51 = vmul.f32 %v867_v10, %v1551_v49  ;;  %v1346_v49 = vld [vmem:[#allocation2 + $0x8] sm:$0xff] }
 0x22d   :  { %v937_v33 = vmul.f32 %v852_v6, %v1554_v50  ;;  %v1348_v6 = vld [vmem:[#allocation2 + $0x18] sm:$0xff] }
 0x22f   :  { %v957_v19 = vpop.permute.xlu0 %956 }
 0x230   :  { %v862_v29 = vpop.permute.xlu1 %861  ;;  %v1054_v42 = vadd.f32 %v957_v19, %v934_v11 }
 0x231   :  { %v939_v59 = vmul.f32 %v862_v29, %v1526_v34 }
 0x232   :  { %v1074_v43 = vmul.f32 0.2, %v1054_v42 }
 0x233   :  { %v967_v40 = vpop.permute.xlu0 %966 }
 0x234   :  { %v872_v17 = vpop.permute.xlu1 %871  ;;  %v1094_v20 = vmax.f32 %v1054_v42, %v1074_v43  ;;  %v1056_v16 = vadd.f32 %v967_v40, %v936_v5  ;;  %v1349_v43 = vld [vmem:[#allocation2 + $0x28] sm:$0xff] }
 0x235   :  { %v941_v0 = vmul.f32 %v872_v17, %v1562_v52 }
 0x236   :  { %v1114_v18 = vadd.f32 %v1094_v20, %v1452_v7  ;;  %v1076_v25 = vmul.f32 0.2, %v1056_v16 }
 0x237   :  { %v977_v31 = vpop.permute.xlu0 %976 }
 0x238   :  { %v962_v47 = vpop.permute.xlu1 %961  ;;  %v1134_v37 = vmul.f32 0.70710677, %v1114_v18  ;;  %v1096_v32 = vmax.f32 %v1056_v16, %v1076_v25  ;;  %v1058_v53 = vadd.f32 %v977_v31, %v938_v21  ;;  %v1350_v21 = vld [vmem:[#allocation2 + $0x38] sm:$0xff] }
 0x239   :  { %v1055_v1 = vadd.f32 %v962_v47, %v935_v62 }
 0x23a   :  { %1154 = vst [vmem:[#allocation5] sm:$0xff] %v1134_v37  ;;  %v1116_v35 = vadd.f32 %v1096_v32, %v1448_v3  ;;  %v1078_v41 = vmul.f32 0.2, %v1058_v53 }
 0x23b   :  { %v1075_v46 = vmul.f32 0.2, %v1055_v1  ;;  %v987_v45 = vpop.permute.xlu0 %986 }
 0x23c   :  { %v972_v38 = vpop.permute.xlu1 %971  ;;  %v1136_v54 = vmul.f32 0.70710677, %v1116_v35  ;;  %v1098_v7 = vmax.f32 %v1058_v53, %v1078_v41  ;;  %v1060_v30 = vadd.f32 %v987_v45, %v940_v51 }
 0x23d   :  { %v1095_v36 = vmax.f32 %v1055_v1, %v1075_v46  ;;  %v1057_v55 = vadd.f32 %v972_v38, %v937_v33 }
 0x23e   :  { %1156 = vst [vmem:[#allocation5 + $0x10] sm:$0xff] %v1136_v54  ;;  %v1118_v57 = vadd.f32 %v1098_v7, %v1454_v8  ;;  %v1080_v48 = vmul.f32 0.2, %v1060_v30 }
 0x23f   :  { %v1115_v44 = vadd.f32 %v1346_v49, %v1095_v36  ;;  %v1077_v3 = vmul.f32 0.2, %v1057_v55 }
 0x240   :  { %v982_v56 = vpop.permute.xlu1 %981  ;;  %v1138_v28 = vmul.f32 0.70710677, %v1118_v57  ;;  %v1100_v50 = vmax.f32 %v1060_v30, %v1080_v48 }
 0x241   :  { %v1135_v60 = vmul.f32 0.70710677, %v1115_v44  ;;  %v1059_v39 = vadd.f32 %v982_v56, %v939_v59  ;;  %v1097_v14 = vmax.f32 %v1057_v55, %v1077_v3  ;;  %v1351_v55 = vld [vmem:[#allocation2 + $0x40] sm:$0xff] }
 0x242   :  { %1158 = vst [vmem:[#allocation5 + $0x20] sm:$0xff] %v1138_v28  ;;  %v1120_v4 = vadd.f32 %v1347_v22, %v1100_v50  ;;  %v1352_v50 = vld [vmem:[#allocation2 + $0x50] sm:$0xff] }
 0x243   :  { %1155 = vst [vmem:[#allocation5 + $0x8] sm:$0xff] %v1135_v60  ;;  %v1079_v34 = vmul.f32 0.2, %v1059_v39  ;;  %v877_v10 = vpop.permute.xlu0 %876  ;;  %v1117_v8 = vadd.f32 %v1348_v6, %v1097_v14 }
 0x244   :  { %v992_v11 = vpop.permute.xlu1 %991  ;;  %v1140_v19 = vmul.f32 0.70710677, %v1120_v4  ;;  %v942_v53 = vmul.f32 %v877_v10, %v1571_v58 }
 0x245   :  { %v1099_v29 = vmax.f32 %v1059_v39, %v1079_v34  ;;  %v1061_v42 = vadd.f32 %v992_v11, %v941_v0  ;;  %v1137_v5 = vmul.f32 0.70710677, %v1117_v8  ;;  %v1353_v0 = vld [vmem:[#allocation2 + $0x48] sm:$0xff] }
 0x246   :  { %1160 = vst [vmem:[#allocation5 + $0x30] sm:$0xff] %v1140_v19 }
 0x247   :  { %v1119_v40 = vadd.f32 %v1349_v43, %v1099_v29  ;;  %v1081_v20 = vmul.f32 0.2, %v1061_v42  ;;  %v887_v16 = vpop.permute.xlu0 %886  ;;  %1157 = vst [vmem:[#allocation5 + $0x18] sm:$0xff] %v1137_v5 }
 0x248   :  { %v882_v52 = vpop.permute.xlu1 %881  ;;  %v944_v41 = vmul.f32 %v887_v16, %v1595_v9 }
 0x249   :  { %v1139_v17 = vmul.f32 0.70710677, %v1119_v40  ;;  %v1101_v62 = vmax.f32 %v1061_v42, %v1081_v20  ;;  %v943_v33 = vmul.f32 %v882_v52, %v1583_v63  ;;  %v1354_v42 = vld [vmem:[#allocation2 + $0x60] sm:$0xff]  ;;  %v1355_v40 = vld [vmem:[#allocation2 + $0x58] sm:$0xff] }
 0x24b   :  { %1159 = vst [vmem:[#allocation5 + $0x28] sm:$0xff] %v1139_v17  ;;  %v1121_v18 = vadd.f32 %v1350_v21, %v1101_v62  ;;  %v897_v25 = vpop.permute.xlu0 %896 }
 0x24c   :  { %v892_v31 = vpop.permute.xlu1 %891  ;;  %v946_v30 = vmul.f32 %v897_v25, %v1577_v61 }
 0x24d   :  { %v1141_v47 = vmul.f32 0.70710677, %v1121_v18  ;;  %v945_v58 = vmul.f32 %v892_v31, %v1610_v15  ;;  %v1356_v31 = vld [vmem:[#allocation2 + $0x70] sm:$0xff] }
 0x24f   :  { %1161 = vst [vmem:[#allocation5 + $0x38] sm:$0xff] %v1141_v47  ;;  %v907_v37 = vpop.permute.xlu0 %906 }
 0x250   :  { %v902_v32 = vpop.permute.xlu1 %901  ;;  %v948_v60 = vmul.f32 %v907_v37, %v1604_v13  ;;  %v1357_v37 = vld [vmem:[#allocation2 + $0x68] sm:$0xff] }
 0x251   :  { %v947_v61 = vmul.f32 %v902_v32, %v1589_v2 }
 0x253   :  { %v997_v1 = vpop.permute.xlu0 %996 }
 0x254   :  { %v1062_v51 = vadd.f32 %v997_v1, %v942_v53  ;;  %v912_v35 = vpop.permute.xlu1 %911 }
 0x255   :  { %v949_v43 = vmul.f32 %v912_v35, %v1601_v12 }
 0x256   :  { %v1082_v46 = vmul.f32 0.2, %v1062_v51 }
 0x257   :  { %v1007_v45 = vpop.permute.xlu0 %1006 }
 0x258   :  { %v1102_v38 = vmax.f32 %v1062_v51, %v1082_v46  ;;  %v1064_v54 = vadd.f32 %v1007_v45, %v944_v41  ;;  %v1002_v7 = vpop.permute.xlu1 %1001 }
 0x259   :  { %v1063_v36 = vadd.f32 %v1002_v7, %v943_v33  ;;  %v1358_v33 = vld [vmem:[#allocation2 + $0x78] sm:$0xff] }
 0x25a   :  { %v1122_v59 = vadd.f32 %v1351_v55, %v1102_v38  ;;  %v1084_v57 = vmul.f32 0.2, %v1064_v54 }
 0x25b   :  { %v1083_v49 = vmul.f32 0.2, %v1063_v36  ;;  %v1017_v44 = vpop.permute.xlu0 %1016 }
 0x25c   :  { %v1142_v48 = vmul.f32 0.70710677, %v1122_v59  ;;  %v1104_v3 = vmax.f32 %v1064_v54, %v1084_v57  ;;  %v1066_v9 = vadd.f32 %v1017_v44, %v946_v30  ;;  %v1012_v56 = vpop.permute.xlu1 %1011 }
 0x25d   :  { %v1103_v28 = vmax.f32 %v1063_v36, %v1083_v49  ;;  %v1065_v63 = vadd.f32 %v1012_v56, %v945_v58 }
 0x25e   :  { %1162 = vst [vmem:[#allocation5 + $0x40] sm:$0xff] %v1142_v48  ;;  %v1124_v39 = vadd.f32 %v1352_v50, %v1104_v3  ;;  %v1086_v14 = vmul.f32 0.2, %v1066_v9  ;;  %v1359_v3 = vld [vmem:[#allocation2 + $0x80] sm:$0xff] }
 0x25f   :  { %v1123_v22 = vadd.f32 %v1353_v0, %v1103_v28  ;;  %v1085_v4 = vmul.f32 0.2, %v1065_v63  ;;  %v1027_v15 = vpop.permute.xlu0 %1026 }
 0x260   :  { %v1144_v34 = vmul.f32 0.70710677, %v1124_v39  ;;  %v1106_v10 = vmax.f32 %v1066_v9, %v1086_v14  ;;  %v1068_v6 = vadd.f32 %v1027_v15, %v948_v60  ;;  %v1022_v8 = vpop.permute.xlu1 %1021  ;;  %v1360_v14 = vld [vmem:[#allocation2 + $0x90] sm:$0xff] }
 0x261   :  { %v1143_v11 = vmul.f32 0.70710677, %v1123_v22  ;;  %v1105_v19 = vmax.f32 %v1065_v63, %v1085_v4  ;;  %v1067_v29 = vadd.f32 %v1022_v8, %v947_v61 }
 0x262   :  { %1164 = vst [vmem:[#allocation5 + $0x50] sm:$0xff] %v1144_v34  ;;  %v1126_v13 = vadd.f32 %v1354_v42, %v1106_v10  ;;  %v1088_v5 = vmul.f32 0.2, %v1068_v6 }
 0x263   :  { %1163 = vst [vmem:[#allocation5 + $0x48] sm:$0xff] %v1143_v11  ;;  %v1125_v2 = vadd.f32 %v1355_v40, %v1105_v19  ;;  %v1087_v20 = vmul.f32 0.2, %v1067_v29  ;;  %v917_v16 = vpop.permute.xlu0 %916 }
 0x264   :  { %v1146_v52 = vmul.f32 0.70710677, %v1126_v13  ;;  %v1108_v17 = vmax.f32 %v1068_v6, %v1088_v5  ;;  %v1032_v62 = vpop.permute.xlu1 %1031  ;;  %v950_v46 = vmul.f32 %v917_v16, %v1626_v24 }
 0x265   :  { %v1145_v21 = vmul.f32 0.70710677, %v1125_v2  ;;  %v1107_v18 = vmax.f32 %v1067_v29, %v1087_v20  ;;  %v1069_v25 = vadd.f32 %v1032_v62, %v949_v43 }
 0x266   :  { %1166 = vst [vmem:[#allocation5 + $0x60] sm:$0xff] %v1146_v52  ;;  %v1128_v47 = vadd.f32 %v1356_v31, %v1108_v17 }
 0x267   :  { %1165 = vst [vmem:[#allocation5 + $0x58] sm:$0xff] %v1145_v21  ;;  %v1127_v32 = vadd.f32 %v1357_v37, %v1107_v18  ;;  %v1089_v53 = vmul.f32 0.2, %v1069_v25  ;;  %v927_v1 = vpop.permute.xlu0 %926 }
 0x268   :  { %v1148_v12 = vmul.f32 0.70710677, %v1128_v47  ;;  %v922_v51 = vpop.permute.xlu1 %921  ;;  %v952_v30 = vmul.f32 %v927_v1, %v1634_v27 }
 0x269   :  { %v1147_v35 = vmul.f32 0.70710677, %v1127_v32  ;;  %v1109_v41 = vmax.f32 %v1069_v25, %v1089_v53  ;;  %v951_v59 = vmul.f32 %v922_v51, %v1623_v23  ;;  %v1361_v23 = vld [vmem:[#allocation2 + $0x88] sm:$0xff] }
 0x26a   :  { %1168 = vst [vmem:[#allocation5 + $0x70] sm:$0xff] %v1148_v12 }
 0x26b   :  { %1167 = vst [vmem:[#allocation5 + $0x68] sm:$0xff] %v1147_v35  ;;  %v1129_v45 = vadd.f32 %v1358_v33, %v1109_v41  ;;  %v1037_v38 = vpop.permute.xlu0 %1036 }
 0x26c   :  { %v1070_v54 = vadd.f32 %v1037_v38, %v950_v46  ;;  %v932_v7 = vpop.permute.xlu1 %931 }
 0x26d   :  { %v1149_v36 = vmul.f32 0.70710677, %v1129_v45  ;;  %v953_v56 = vmul.f32 %v932_v7, %v1631_v26  ;;  %v1362_v26 = vld [vmem:[#allocation2 + $0x98] sm:$0xff] }
 0x26e   :  { %v1090_v55 = vmul.f32 0.2, %v1070_v54 }
 0x26f   :  { %1169 = vst [vmem:[#allocation5 + $0x78] sm:$0xff] %v1149_v36  ;;  %v1047_v57 = vpop.permute.xlu0 %1046 }
 0x270   :  { %v1110_v58 = vmax.f32 %v1070_v54, %v1090_v55  ;;  %v1072_v49 = vadd.f32 %v1047_v57, %v952_v30  ;;  %v1042_v44 = vpop.permute.xlu1 %1041 }
 0x271   :  { %v1071_v48 = vadd.f32 %v1042_v44, %v951_v59 }
 0x272   :  { %v1130_v24 = vadd.f32 %v1359_v3, %v1110_v58  ;;  %v1092_v9 = vmul.f32 0.2, %v1072_v49 }
 0x273   :  { %v1091_v28 = vmul.f32 0.2, %v1071_v48 }
 0x274   :  { %v1150_v63 = vmul.f32 0.70710677, %v1130_v24  ;;  %v1112_v60 = vmax.f32 %v1072_v49, %v1092_v9  ;;  %v1052_v50 = vpop.permute.xlu1 %1051 }
 0x275   :  { %v1111_v39 = vmax.f32 %v1071_v48, %v1091_v28  ;;  %v1073_v27 = vadd.f32 %v1052_v50, %v953_v56 }
 0x276   :  { %1170 = vst [vmem:[#allocation5 + $0x80] sm:$0xff] %v1150_v63  ;;  %v1132_v61 = vadd.f32 %v1360_v14, %v1112_v60 }
 0x277   :  { %v1131_v0 = vadd.f32 %v1361_v23, %v1111_v39  ;;  %v1093_v22 = vmul.f32 0.2, %v1073_v27 }
 0x278   :  { %v1152_v4 = vmul.f32 0.70710677, %v1132_v61 }
 0x279   :  { %v1151_v15 = vmul.f32 0.70710677, %v1131_v0  ;;  %v1113_v34 = vmax.f32 %v1073_v27, %v1093_v22 }
 0x27a   :  { %1172 = vst [vmem:[#allocation5 + $0x90] sm:$0xff] %v1152_v4 }
 0x27b   :  { %1171 = vst [vmem:[#allocation5 + $0x88] sm:$0xff] %v1151_v15  ;;  %v1133_v10 = vadd.f32 %v1362_v26, %v1113_v34 }
 0x27d   :  { %v1153_v6 = vmul.f32 0.70710677, %v1133_v10 }
 0x27f   :  { %1173 = vst [vmem:[#allocation5 + $0x98] sm:$0xff] %v1153_v6 }
 0x280   :  { %1394 = shalt.err (!%p1391_p9)
}
 0x281   :  { %1185 = dma.vmem_to_hbm [thread:$0]  %s1180_s29, 2560, %s1804_s5, [#allocation4], %s1408_s21, %s1408_s21, %s1409_s22  }
 0x282   :  { %1405 = dma.done.wait [#allocation4], 2560  }
 0x283   :  { %1406 = vsyncadd [#allocation4], 4294964736 }
 0x284   :  { %1189 = vsyncpa [#allocation3], 1 }
 0x285   :  { %1190 = vsyncpa [#allocation4], 1 }

</bundles_post_ra>
